<compile_context>
chip_gen: v6e
topology: v6e:2x2x1
jax: 0.10.0
libtpu: 0.0.40
codegen_flags: <defaults>
</compile_context>

<pallas_src>
import jax
import jax.numpy as jnp
from jax import lax
from jax.experimental import pallas as pl
from jax.experimental.pallas import tpu as pltpu


def _issue_gather(ids_ref, emb_hbm, gath_ref, sem, blk, slot, tile_t):
    """Issue `tile_t` row-gather DMAs (HBM emb table -> VMEM slot) for token block `blk`."""
    base = blk * tile_t

    @pl.loop(0, tile_t)
    def _(j):
        tok = ids_ref[base + j]                       # SMEM scalar read (scalar prefetch)
        pltpu.make_async_copy(emb_hbm.at[tok], gath_ref.at[slot, j], sem.at[slot]).start()


def _wait_gather(emb_hbm, gath_ref, sem, slot, tile_t):
    """Wait for all `tile_t` row DMAs previously issued into `slot`."""
    @pl.loop(0, tile_t)
    def _(j):
        pltpu.make_async_copy(emb_hbm.at[0], gath_ref.at[slot, 0], sem.at[slot]).wait()


def _text_cls_kernel(ids_ref, bag_ref, emb_hbm, w_ref, b_ref, out_ref,
                     gath_ref, sem, acc_ref, cnt_ref):
    """One token-block grid step.

    ids_ref  : (Tp,)        int32  SMEM  scalar-prefetched token ids (padding -> id 0)
    bag_ref  : (1, TT)      int32  VMEM  bag id per token in this block (-1 for padding)
    emb_hbm  : (Vp, Dp)     f32    HBM   embedding table (gathered row-by-row via DMA)
    w_ref    : (Dp, Cp)     bf16   VMEM  fc weight, transposed + padded (resident)
    b_ref    : (1, Cp)      f32    VMEM  fc bias, padded (resident)
    out_ref  : (Bp, Cp)     f32    VMEM  logits (written on the last step only)
    gath_ref : (2, TT, Dp)  f32    VMEM  double-buffered gathered embedding rows
    sem      : DMA sem (2,)
    acc_ref  : (Bp, Dp)     f32    VMEM  per-bag embedding-sum accumulator
    cnt_ref  : (Bp, 1)      f32    VMEM  per-bag token counts
    """
    t = pl.program_id(0)
    nT = pl.num_programs(0)
    TT = gath_ref.shape[1]
    Bp = acc_ref.shape[0]

    slot = lax.rem(t, 2)
    nxt = lax.rem(t + 1, 2)

    @pl.when(t == 0)
    def _init():
        acc_ref[...] = jnp.zeros_like(acc_ref)
        cnt_ref[...] = jnp.zeros_like(cnt_ref)
        _issue_gather(ids_ref, emb_hbm, gath_ref, sem, 0, 0, TT)      # prime slot 0

    @pl.when(t + 1 < nT)
    def _prefetch_next():
        _issue_gather(ids_ref, emb_hbm, gath_ref, sem, t + 1, nxt, TT)

    _wait_gather(emb_hbm, gath_ref, sem, slot, TT)

    # Bag-assignment matrix for this token block: (Bp, TT), exact 0/1 in f32.
    row_iota = lax.broadcasted_iota(jnp.int32, (Bp, TT), 0)
    assign = (bag_ref[...] == row_iota).astype(jnp.float32)           # (1,TT) bcast vs (Bp,TT)

    # Segment-sum via MXU: (Bp, TT) @ (TT, Dp) -> (Bp, Dp), f32 accumulation.
    acc_ref[...] += jnp.dot(assign, gath_ref[slot], preferred_element_type=jnp.float32)
    cnt_ref[...] += jnp.sum(assign, axis=1, keepdims=True)

    @pl.when(t == nT - 1)
    def _finalize():
        # Mean (EmbeddingBag mode='mean'); empty bags -> count clamped to 1 -> zeros.
        inv = pl.reciprocal(jnp.maximum(cnt_ref[...], 1.0), approx=True)   # EUP slot
        mean = (acc_ref[...] * inv).astype(jnp.bfloat16)
        out_ref[...] = (jnp.dot(mean, w_ref[...], preferred_element_type=jnp.float32)
                        + b_ref[...])


def _round_up(x, m):
    return (x + m - 1) // m * m


def text_classification_forward(text, offsets, emb_tbl, fc_w, fc_b, *, tile_t=128):
    """text: (T,) int token ids; offsets: (B,) int bag starts (PyTorch EmbeddingBag style)."""
    T = int(text.shape[0])
    B = int(offsets.shape[0])
    V, D = emb_tbl.shape
    C = fc_w.shape[0]

    TT = tile_t
    Tp = _round_up(max(T, TT), TT)          # token axis padded to whole blocks
    Dp = _round_up(D, 128)                  # lane-dense embedding dim
    Cp = _round_up(C, 128)                  # lane-dense output
    Bp = _round_up(max(B, 16), 16)          # sublane-friendly M; fills MXU as B grows
    Vp = _round_up(V, 8)

    text = text.astype(jnp.int32)
    offsets = offsets.astype(jnp.int32)

    # Per-token bag id (offsets sorted non-decreasing, as in PyTorch EmbeddingBag).
    # Padding tokens get bag id -1 so they never contribute to any bag.
    t_idx = jnp.arange(Tp, dtype=jnp.int32)
    bag_id = jnp.sum(offsets[None, :] <= t_idx[:, None], axis=1).astype(jnp.int32) - 1
    bag_id = jnp.where(t_idx < T, bag_id, -1)

    ids = jnp.zeros((Tp,), jnp.int32).at[:T].set(text)    # padded slots gather row 0 (harmless)
    bag_row = bag_id.reshape(1, Tp)

    # Embedding table stays in HBM (ANY); only its D axis is padded so each gathered row
    # is a contiguous Dp-wide f32 row. fc weight is resident in VMEM as bf16.
    emb_pad = jnp.zeros((Vp, Dp), jnp.float32).at[:V, :D].set(emb_tbl.astype(jnp.float32))
    w_pad = jnp.zeros((Dp, Cp), jnp.bfloat16).at[:D, :C].set(fc_w.T.astype(jnp.bfloat16))
    b_pad = jnp.zeros((1, Cp), jnp.float32).at[0, :C].set(fc_b.astype(jnp.float32))

    grid = (Tp // TT,)

    out = pl.pallas_call(
        _text_cls_kernel,
        out_shape=jax.ShapeDtypeStruct((Bp, Cp), jnp.float32),
        grid_spec=pltpu.PrefetchScalarGridSpec(
            num_scalar_prefetch=1,
            grid=grid,
            in_specs=[
                pl.BlockSpec((1, TT), lambda t, _ids: (0, t)),      # per-token bag ids
                pl.BlockSpec(memory_space=pl.ANY),                  # emb table (raw HBM ref)
                pl.BlockSpec((Dp, Cp), lambda t, _ids: (0, 0)),     # fc weight (transposed)
                pl.BlockSpec((1, Cp), lambda t, _ids: (0, 0)),      # fc bias
            ],
            out_specs=pl.BlockSpec((Bp, Cp), lambda t, _ids: (0, 0)),
            scratch_shapes=[
                pltpu.VMEM((2, TT, Dp), jnp.float32),               # double-buffered gather
                pltpu.SemaphoreType.DMA((2,)),
                pltpu.VMEM((Bp, Dp), jnp.float32),                  # per-bag embedding sums
                pltpu.VMEM((Bp, 1), jnp.float32),                   # per-bag token counts
            ],
        ),
        compiler_params=pltpu.CompilerParams(
            dimension_semantics=("arbitrary",),
            vmem_limit_bytes=32 * 1024 * 1024,
        ),
    )(ids, bag_row, emb_pad, w_pad, b_pad)

    return out[:B, :C]


if __name__ == "__main__":
    # Small, deterministic setup. T=300 -> 3 token blocks of 128, exercising the
    # double-buffered gather path; one bag is intentionally empty.
    vocab_size, embed_dim, num_class = 500, 32, 4
    T, B = 300, 8

    key = jax.random.PRNGKey(0)
    k_emb, k_w, k_b, k_text = jax.random.split(key, 4)

    # Parameter init (shapes match nn.EmbeddingBag / nn.Linear).
    emb_tbl = jax.random.normal(k_emb, (vocab_size, embed_dim), dtype=jnp.float32)
    bound = 1.0 / (embed_dim ** 0.5)
    fc_w = jax.random.uniform(k_w, (num_class, embed_dim), minval=-bound, maxval=bound,
                              dtype=jnp.float32)
    fc_b = jax.random.uniform(k_b, (num_class,), minval=-bound, maxval=bound,
                              dtype=jnp.float32)

    # Example batch: 8 bags over a flat token stream of length 300; bag 2 is empty
    # (offsets[2] == offsets[3]) -> PyTorch EmbeddingBag(mode='mean') gives zeros there.
    text = jax.random.randint(k_text, (T,), 0, vocab_size, dtype=jnp.int32)
    offsets = jnp.array([0, 37, 81, 81, 166, 210, 251, 287], dtype=jnp.int32)

    out = text_classification_forward(text, offsets, emb_tbl, fc_w, fc_b)
    out = jax.block_until_ready(out)

    # Pure-JAX f32 reference (EmbeddingBag mean + Linear). Kernel uses a bf16 final matmul
    # and an approximate reciprocal, hence the loosened tolerance.
    ends = jnp.concatenate([offsets[1:], jnp.array([T], dtype=jnp.int32)])
    t_idx = jnp.arange(T)
    assign = (t_idx[None, :] >= offsets[:, None]) & (t_idx[None, :] < ends[:, None])
    counts = jnp.maximum(assign.sum(axis=1, keepdims=True), 1).astype(jnp.float32)
    ref = (assign.astype(jnp.float32) @ emb_tbl[text]) / counts
    ref = ref @ fc_w.T + fc_b

    assert out.shape == (B, num_class)
    assert jnp.allclose(out, ref, atol=3e-2, rtol=3e-2)

    print("KERNEL_OK")
</pallas_src>

<mosaic_0001>
module attributes {stable_mosaic.version = 11 : i64} {
  func.func @_text_cls_kernel(%arg0: i32, %arg1: memref<384xi32, #tpu.memory_space<smem>>, %arg2: memref<1x128xi32, #tpu.memory_space<vmem>>, %arg3: memref<504x128xf32, #tpu.memory_space<any>>, %arg4: memref<128x128xbf16, #tpu.memory_space<vmem>>, %arg5: memref<1x128xf32, #tpu.memory_space<vmem>>, %arg6: memref<16x128xf32, #tpu.memory_space<vmem>>, %arg7: memref<2x128x128xf32, #tpu.memory_space<vmem>>, %arg8: memref<2x!tpu.dma_semaphore, #tpu.memory_space<semaphore_mem>>, %arg9: memref<16x128xf32, #tpu.memory_space<vmem>>, %arg10: memref<16x1xf32, #tpu.memory_space<vmem>>) attributes {dimension_semantics = [#tpu.dimension_semantics<arbitrary>], iteration_bounds = array<i64: 3>, scalar_prefetch = 1 : i64, scratch_operands = 4 : i64, tpu.core_type = #tpu.core_type<tc>, window_params = [{transform_indices = @transform_0, window_bounds = array<i64: 1, 128>}, {}, {pipeline_mode = #tpu.pipeline_mode<synchronous>, transform_indices = @transform_2, window_bounds = array<i64: 128, 128>}, {pipeline_mode = #tpu.pipeline_mode<synchronous>, transform_indices = @transform_3, window_bounds = array<i64: 1, 128>}, {pipeline_mode = #tpu.pipeline_mode<synchronous>, transform_indices = @transform_4, window_bounds = array<i64: 16, 128>}]} {
    %c2_i32 = arith.constant 2 : i32
    %0 = arith.remsi %arg0, %c2_i32 : i32
    %c1_i32 = arith.constant 1 : i32
    %1 = arith.addi %arg0, %c1_i32 : i32
    %c2_i32_0 = arith.constant 2 : i32
    %2 = arith.remsi %1, %c2_i32_0 : i32
    %c0_i32 = arith.constant 0 : i32
    %3 = arith.cmpi eq, %arg0, %c0_i32 : i32
    %4 = arith.extui %3 : i1 to i32
    %c0_i32_1 = arith.constant 0 : i32
    %5 = arith.cmpi ne, %4, %c0_i32_1 : i32
    scf.if %5 {
      %cst_20 = arith.constant 0.000000e+00 : f32
      %32 = vector.broadcast %cst_20 : f32 to vector<16x128xf32>
      %c0_21 = arith.constant 0 : index
      %c0_22 = arith.constant 0 : index
      %33 = vector.load %arg9[%c0_21, %c0_22] : memref<16x128xf32, #tpu.memory_space<vmem>>, vector<16x128xf32>
      tpu.vector_store %arg9[%c0_21, %c0_22], %32 {strides = array<i32>} : memref<16x128xf32, #tpu.memory_space<vmem>>, vector<16x128xf32>,
      %cst_23 = arith.constant 0.000000e+00 : f32
      %34 = vector.broadcast %cst_23 : f32 to vector<16x1xf32>
      %c0_24 = arith.constant 0 : index
      %c0_25 = arith.constant 0 : index
      %35 = vector.load %arg10[%c0_24, %c0_25] : memref<16x1xf32, #tpu.memory_space<vmem>>, vector<16x1xf32>
      tpu.vector_store %arg10[%c0_24, %c0_25], %34 {strides = array<i32>} : memref<16x1xf32, #tpu.memory_space<vmem>>, vector<16x1xf32>,
      %c0_i32_26 = arith.constant 0 : i32
      %c128_i32_27 = arith.constant 128 : i32
      %36 = arith.addi %c0_i32_26, %c128_i32_27 : i32
      %c1_i32_28 = arith.constant 1 : i32
      scf.for %arg11 = %c0_i32_26 to %36 step %c1_i32_28  : i32 {
        %c1_i32_30 = arith.constant 1 : i32
        %37 = arith.muli %arg11, %c1_i32_30 : i32
        %c0_i32_31 = arith.constant 0 : i32
        %38 = arith.addi %c0_i32_31, %37 : i32
        %c0_i32_32 = arith.constant 0 : i32
        %39 = arith.addi %c0_i32_32, %38 : i32
        %40 = arith.index_cast %39 : i32 to index
        %41 = memref.load %arg1[%40] : memref<384xi32, #tpu.memory_space<smem>>
        %c0_i32_33 = arith.constant 0 : i32
        %c0_i32_34 = arith.constant 0 : i32
        %c0_i32_35 = arith.constant 0 : i32
        %42 = tpu.memref_slice %arg3[%41, %c0_i32_35] : memref<504x128xf32, #tpu.memory_space<any>> -> memref<1x128xf32, #tpu.memory_space<any>>
        %43 = tpu.memref_squeeze %42 : memref<1x128xf32, #tpu.memory_space<any>> -> memref<128xf32, #tpu.memory_space<any>>
        %c0_i32_36 = arith.constant 0 : i32
        %44 = tpu.memref_slice %arg7[%c0_i32_33, %38, %c0_i32_36] : memref<2x128x128xf32, #tpu.memory_space<vmem>> -> memref<1x1x128xf32, #tpu.memory_space<vmem>>
        %45 = tpu.memref_squeeze %44 : memref<1x1x128xf32, #tpu.memory_space<vmem>> -> memref<128xf32, #tpu.memory_space<vmem>>
        %46 = tpu.memref_slice %arg8[%c0_i32_34] : memref<2x!tpu.dma_semaphore, #tpu.memory_space<semaphore_mem>> -> memref<1x!tpu.dma_semaphore, #tpu.memory_space<semaphore_mem>>
        %47 = tpu.memref_squeeze %46 : memref<1x!tpu.dma_semaphore, #tpu.memory_space<semaphore_mem>> -> memref<!tpu.dma_semaphore, #tpu.memory_space<semaphore_mem>>
        tpu.enqueue_dma source(%43 : memref<128xf32, #tpu.memory_space<any>>) target(%45 : memref<128xf32, #tpu.memory_space<vmem>>) target_semaphore(%47 : memref<!tpu.dma_semaphore, #tpu.memory_space<semaphore_mem>>)
      }
      %c128_i32_29 = arith.constant 128 : i32
    } else {
    }
    %c1_i32_2 = arith.constant 1 : i32
    %6 = arith.addi %arg0, %c1_i32_2 : i32
    %c3_i32 = arith.constant 3 : i32
    %7 = arith.cmpi slt, %6, %c3_i32 : i32
    %8 = arith.extui %7 : i1 to i32
    %c0_i32_3 = arith.constant 0 : i32
    %9 = arith.cmpi ne, %8, %c0_i32_3 : i32
    scf.if %9 {
      %c1_i32_20 = arith.constant 1 : i32
      %32 = arith.addi %arg0, %c1_i32_20 : i32
      %c128_i32_21 = arith.constant 128 : i32
      %33 = arith.muli %32, %c128_i32_21 : i32
      %c0_i32_22 = arith.constant 0 : i32
      %c128_i32_23 = arith.constant 128 : i32
      %34 = arith.addi %c0_i32_22, %c128_i32_23 : i32
      %c1_i32_24 = arith.constant 1 : i32
      scf.for %arg11 = %c0_i32_22 to %34 step %c1_i32_24  : i32 {
        %c1_i32_26 = arith.constant 1 : i32
        %35 = arith.muli %arg11, %c1_i32_26 : i32
        %c0_i32_27 = arith.constant 0 : i32
        %36 = arith.addi %c0_i32_27, %35 : i32
        %37 = arith.addi %33, %36 : i32
        %38 = arith.index_cast %37 : i32 to index
        %39 = memref.load %arg1[%38] : memref<384xi32, #tpu.memory_space<smem>>
        %c0_i32_28 = arith.constant 0 : i32
        %40 = tpu.memref_slice %arg3[%39, %c0_i32_28] : memref<504x128xf32, #tpu.memory_space<any>> -> memref<1x128xf32, #tpu.memory_space<any>>
        %41 = tpu.memref_squeeze %40 : memref<1x128xf32, #tpu.memory_space<any>> -> memref<128xf32, #tpu.memory_space<any>>
        %c0_i32_29 = arith.constant 0 : i32
        %42 = tpu.memref_slice %arg7[%2, %36, %c0_i32_29] : memref<2x128x128xf32, #tpu.memory_space<vmem>> -> memref<1x1x128xf32, #tpu.memory_space<vmem>>
        %43 = tpu.memref_squeeze %42 : memref<1x1x128xf32, #tpu.memory_space<vmem>> -> memref<128xf32, #tpu.memory_space<vmem>>
        %44 = tpu.memref_slice %arg8[%2] : memref<2x!tpu.dma_semaphore, #tpu.memory_space<semaphore_mem>> -> memref<1x!tpu.dma_semaphore, #tpu.memory_space<semaphore_mem>>
        %45 = tpu.memref_squeeze %44 : memref<1x!tpu.dma_semaphore, #tpu.memory_space<semaphore_mem>> -> memref<!tpu.dma_semaphore, #tpu.memory_space<semaphore_mem>>
        tpu.enqueue_dma source(%41 : memref<128xf32, #tpu.memory_space<any>>) target(%43 : memref<128xf32, #tpu.memory_space<vmem>>) target_semaphore(%45 : memref<!tpu.dma_semaphore, #tpu.memory_space<semaphore_mem>>)
      }
      %c128_i32_25 = arith.constant 128 : i32
    } else {
    }
    %c0_i32_4 = arith.constant 0 : i32
    %c128_i32 = arith.constant 128 : i32
    %10 = arith.addi %c0_i32_4, %c128_i32 : i32
    %c1_i32_5 = arith.constant 1 : i32
    scf.for %arg11 = %c0_i32_4 to %10 step %c1_i32_5  : i32 {
      %c0_i32_20 = arith.constant 0 : i32
      %c0_i32_21 = arith.constant 0 : i32
      %c0_i32_22 = arith.constant 0 : i32
      %32 = tpu.memref_slice %arg3[%c0_i32_20, %c0_i32_22] : memref<504x128xf32, #tpu.memory_space<any>> -> memref<1x128xf32, #tpu.memory_space<any>>
      %33 = tpu.memref_squeeze %32 : memref<1x128xf32, #tpu.memory_space<any>> -> memref<128xf32, #tpu.memory_space<any>>
      %c0_i32_23 = arith.constant 0 : i32
      %34 = tpu.memref_slice %arg7[%0, %c0_i32_21, %c0_i32_23] : memref<2x128x128xf32, #tpu.memory_space<vmem>> -> memref<1x1x128xf32, #tpu.memory_space<vmem>>
      %35 = tpu.memref_squeeze %34 : memref<1x1x128xf32, #tpu.memory_space<vmem>> -> memref<128xf32, #tpu.memory_space<vmem>>
      %36 = tpu.memref_slice %arg8[%0] : memref<2x!tpu.dma_semaphore, #tpu.memory_space<semaphore_mem>> -> memref<1x!tpu.dma_semaphore, #tpu.memory_space<semaphore_mem>>
      %37 = tpu.memref_squeeze %36 : memref<1x!tpu.dma_semaphore, #tpu.memory_space<semaphore_mem>> -> memref<!tpu.dma_semaphore, #tpu.memory_space<semaphore_mem>>
      tpu.wait_dma2 semaphore(%37 : memref<!tpu.dma_semaphore, #tpu.memory_space<semaphore_mem>>) src(%33 : memref<128xf32, #tpu.memory_space<any>>) dst(%35 : memref<128xf32, #tpu.memory_space<vmem>>)
    }
    %11 = tpu.iota {dimensions = array<i32: 0>} : vector<16x128xi32>
    %c0 = arith.constant 0 : index
    %c0_6 = arith.constant 0 : index
    %12 = vector.load %arg2[%c0, %c0_6] : memref<1x128xi32, #tpu.memory_space<vmem>>, vector<1x128xi32>
    %13 = vector.broadcast %12 : vector<1x128xi32> to vector<16x128xi32>
    %14 = arith.cmpi eq, %13, %11 : vector<16x128xi32>
    %15 = arith.extui %14 : vector<16x128xi1> to vector<16x128xi32>
    %16 = arith.sitofp %15 : vector<16x128xi32> to vector<16x128xf32>
    %c0_7 = arith.constant 0 : index
    %c0_8 = arith.constant 0 : index
    %17 = vector.load %arg9[%c0_7, %c0_8] : memref<16x128xf32, #tpu.memory_space<vmem>>, vector<16x128xf32>
    %18 = arith.index_cast %0 : i32 to index
    %c0_9 = arith.constant 0 : index
    %c0_10 = arith.constant 0 : index
    %19 = vector.load %arg7[%18, %c0_9, %c0_10] : memref<2x128x128xf32, #tpu.memory_space<vmem>>, vector<1x128x128xf32>
    %20 = vector.shape_cast %19 : vector<1x128x128xf32> to vector<128x128xf32>
    %cst = arith.constant dense<0.000000e+00> : vector<16x128xf32>
    %21 = tpu.matmul %16, %20, %cst {dimension_numbers = #tpu.dot_dimension_numbers<[1], [0], [0], [1], [0, 0, 1, 1], [], []>} : vector<16x128xf32>, vector<128x128xf32>, vector<16x128xf32> -> vector<16x128xf32>
    %22 = arith.addf %17, %21 : vector<16x128xf32>
    %c0_11 = arith.constant 0 : index
    %c0_12 = arith.constant 0 : index
    %23 = vector.load %arg9[%c0_11, %c0_12] : memref<16x128xf32, #tpu.memory_space<vmem>>, vector<16x128xf32>
    tpu.vector_store %arg9[%c0_11, %c0_12], %22 {strides = array<i32>} : memref<16x128xf32, #tpu.memory_space<vmem>>, vector<16x128xf32>,
    %c0_13 = arith.constant 0 : index
    %c0_14 = arith.constant 0 : index
    %24 = vector.load %arg10[%c0_13, %c0_14] : memref<16x1xf32, #tpu.memory_space<vmem>>, vector<16x1xf32>
    %cst_15 = arith.constant dense<0.000000e+00> : vector<16xf32>
    %25 = vector.multi_reduction <add>, %16, %cst_15 [1] : vector<16x128xf32> to vector<16xf32>
    %26 = vector.shape_cast %25 : vector<16xf32> to vector<16x1xf32>
    %27 = arith.addf %24, %26 : vector<16x1xf32>
    %c0_16 = arith.constant 0 : index
    %c0_17 = arith.constant 0 : index
    %28 = vector.load %arg10[%c0_16, %c0_17] : memref<16x1xf32, #tpu.memory_space<vmem>>, vector<16x1xf32>
    tpu.vector_store %arg10[%c0_16, %c0_17], %27 {strides = array<i32>} : memref<16x1xf32, #tpu.memory_space<vmem>>, vector<16x1xf32>,
    %c2_i32_18 = arith.constant 2 : i32
    %29 = arith.cmpi eq, %arg0, %c2_i32_18 : i32
    %30 = arith.extui %29 : i1 to i32
    %c0_i32_19 = arith.constant 0 : i32
    %31 = arith.cmpi ne, %30, %c0_i32_19 : i32
    scf.if %31 {
      %c0_20 = arith.constant 0 : index
      %c0_21 = arith.constant 0 : index
      %32 = vector.load %arg10[%c0_20, %c0_21] : memref<16x1xf32, #tpu.memory_space<vmem>>, vector<16x1xf32>
      %cst_22 = arith.constant 1.000000e+00 : f32
      %33 = vector.broadcast %cst_22 : f32 to vector<16x1xf32>
      %34 = arith.maximumf %32, %33 : vector<16x1xf32>
      %35 = tpu.reciprocal %34 {approx = true} : vector<16x1xf32> -> vector<16x1xf32>
      %c0_23 = arith.constant 0 : index
      %c0_24 = arith.constant 0 : index
      %36 = vector.load %arg9[%c0_23, %c0_24] : memref<16x128xf32, #tpu.memory_space<vmem>>, vector<16x128xf32>
      %37 = vector.broadcast %35 : vector<16x1xf32> to vector<16x128xf32>
      %38 = arith.mulf %36, %37 : vector<16x128xf32>
      %39 = arith.truncf %38 : vector<16x128xf32> to vector<16x128xbf16>
      %c0_25 = arith.constant 0 : index
      %c0_26 = arith.constant 0 : index
      %40 = vector.load %arg4[%c0_25, %c0_26] : memref<128x128xbf16, #tpu.memory_space<vmem>>, vector<128x128xbf16>
      %cst_27 = arith.constant dense<0.000000e+00> : vector<16x128xf32>
      %41 = tpu.matmul %39, %40, %cst_27 {dimension_numbers = #tpu.dot_dimension_numbers<[1], [0], [0], [1], [0, 0, 1, 1], [], []>} : vector<16x128xbf16>, vector<128x128xbf16>, vector<16x128xf32> -> vector<16x128xf32>
      %c0_28 = arith.constant 0 : index
      %c0_29 = arith.constant 0 : index
      %42 = vector.load %arg5[%c0_28, %c0_29] : memref<1x128xf32, #tpu.memory_space<vmem>>, vector<1x128xf32>
      %43 = vector.broadcast %42 : vector<1x128xf32> to vector<16x128xf32>
      %44 = arith.addf %41, %43 : vector<16x128xf32>
      %c0_30 = arith.constant 0 : index
      %c0_31 = arith.constant 0 : index
      %45 = vector.load %arg6[%c0_30, %c0_31] : memref<16x128xf32, #tpu.memory_space<vmem>>, vector<16x128xf32>
      tpu.vector_store %arg6[%c0_30, %c0_31], %44 {strides = array<i32>} : memref<16x128xf32, #tpu.memory_space<vmem>>, vector<16x128xf32>,
    } else {
    }
    return
  }
  func.func @transform_0(%arg0: i32, %arg1: memref<384xi32, #tpu.memory_space<smem>>) -> (i32, i32) {
    %c0_i32 = arith.constant 0 : i32
    %c0_i32_0 = arith.constant 0 : i32
    return %c0_i32, %arg0 : i32, i32
  }
  func.func @transform_2(%arg0: i32, %arg1: memref<384xi32, #tpu.memory_space<smem>>) -> (i32, i32) {
    %c0_i32 = arith.constant 0 : i32
    %c0_i32_0 = arith.constant 0 : i32
    %c0_i32_1 = arith.constant 0 : i32
    return %c0_i32, %c0_i32_0 : i32, i32
  }
  func.func @transform_3(%arg0: i32, %arg1: memref<384xi32, #tpu.memory_space<smem>>) -> (i32, i32) {
    %c0_i32 = arith.constant 0 : i32
    %c0_i32_0 = arith.constant 0 : i32
    %c0_i32_1 = arith.constant 0 : i32
    return %c0_i32, %c0_i32_0 : i32, i32
  }
  func.func @transform_4(%arg0: i32, %arg1: memref<384xi32, #tpu.memory_space<smem>>) -> (i32, i32) {
    %c0_i32 = arith.constant 0 : i32
    %c0_i32_0 = arith.constant 0 : i32
    %c0_i32_1 = arith.constant 0 : i32
    return %c0_i32, %c0_i32_0 : i32, i32
  }
}

</mosaic_0001>

<bundles_post_ra>
// kernel: tpu_custom_call.1
= control target key start
LH: loop header
LB: loop body
LE: loop exit
PB: predicated region body
PF: predicated region fallthrough
CT: control target
= control target key end

     0   :  { %s1072_s18 = smov [#allocation7]   ;;  %s1335_s0 = inlined_call_operand.hbm [shape: s32[384], index: 0, kind: input, shape index: {}]   ;;  %s1336_s1 = inlined_call_operand.hbm [shape: s32[1,384], index: 1, kind: input, shape index: {}]   ;;  %s1337_s2 = inlined_call_operand.hbm [shape: f32[504,128], index: 2, kind: input, shape index: {}]   ;;  %s1338_s3 = inlined_call_operand.hbm [shape: bf16[128,128], index: 3, kind: input, shape index: {}]   ;;  %s1339_s4 = inlined_call_operand.vmem [shape: f32[1,128], index: 4, kind: input, shape index: {}]   ;;  %s1340_s5 = inlined_call_operand.hbm [shape: f32[16,128], index: 5, kind: output, shape index: {}]  }
   0x1   :  { %1344 = sst [smem:[#allocation25_spill]] %s1336_s1 }
   0x2   :  { %11 = dma.hbm_to_smem %s1335_s0, 48, %s1072_s18, [#allocation6] }
   0x3   :  { %1028 = dma.done.wait [#allocation6], 48 }
   0x4   :  { %1029 = vsyncadd [#allocation6], 4294967248 }
   0x5   :  { %13 = sfence }
   0x6   :  { %14 = vsyncpa [#allocation9], 0 }
   0x7   :  { %16 = vsyncpa [#allocation9 + $0x1], 0 }
   0x8   :  { %17 = vsyncpa [#allocation12], 0 }
   0x9   :  { %18 = vsyncpa [#allocation10], 0  ;;  %s1121_s21 = smov 0   ;;  %s1123_s22 = smov 0  }
   0xa   :  { %s1125_s23 = smov 0   ;;  %s1127_s24 = smov 0  }
   0xb LB: > { %s1140_s0 = sadd.s32 4294967295, %s1058_s24   ;;  %p44_p0 = scmp.ne.s32.totalorder %s1050_s22, %s1046_s21  ;;  %s1058_s24 = sphi %s1127_s24, %s1358_s24   ;;  %s1054_s23 = sphi %s1125_s23, %s1357_s23   ;;  %s1050_s22 = sphi %s1123_s22, %s1356_s22   ;;  %s1046_s21 = sphi %s1121_s21, %s1355_s21  }
   0xc   : > { %p1341_p1 = scmp.eq.s32.totalorder %s1140_s0, 0  ;;  %p645_p2 = scmp.ge.s32.totalorder %s1058_s24, 1 }
   0xd   : > { %p118_p3 = scmp.lt.s32.totalorder %s1058_s24, 4  ;;  %s1073_s27 = smov [#allocation11]  }
   0xe   : > { %p1149_p5 = por %p1341_p1, %p44_p0  ;;  %s130_s28 = sshll.u32 %s1073_s27, 4  ;;  %s131_s28 = int_to_ptr.vmem [resolvable:$true] %s130_s28 }
   0xf   : > { %p1153_p6 = pnand %p645_p2, %p118_p3  ;;  %s1166_s30 = sadd.s32 1, %s1058_s24  }
  0x10   : > { %s1345_s25 = scalar_select %p1149_p5, 1, 0 }
  0x11   : > { %s1346_s26 = scalar_select %p1153_p6, 1, 0 }
  0x12   : > { %p775_p7 = pneg %p1153_p6  ;;  %s31_s6 = sadd.s32 1, %s1054_s23 }
  0x13   : > { %s28_s7 = ssub.s32 %s1058_s24, %s1166_s30  ;;  %s889_s8 = scalar_lea.vmem %s131_s28, 1024 }
  0x14   : > { %p1161_p8 = pnand %p775_p7, %p1341_p1  ;;  %p890_p10 = scmp.ne.s32.totalorder %s131_s28, %s889_s8 }
  0x15   : > { %p897_p13 = scmp.lt.s32.totalorder %s131_s28, %s131_s28  ;;  %p898_p0 = scmp.lt.s32.totalorder %s889_s8, %s889_s8 }
  0x16   : > { %p880_p9 = pneg %p1161_p8 }
  0x17   : > { %p899_p2 = por %p898_p0, %p897_p13 }
  0x18   : > { %p892_p11 = pnand %p890_p10, %p880_p9 }
  0x1a   : > { %p893_p12 = pneg %p892_p11 }
  0x1c   : > { %p900_p3 = pnand %p899_p2, %p893_p12 }
  0x1e   : > { %903 = shalt.err (!%p900_p3)
}
  0x1f   : > { %s1074_s9 = smov 64   ;;  %s1075_s10 = smov 4  }
  0x20   : > { %778 = dma.hbm_to_vmem [thread:$0]  (!%p1161_p8), %s1338_s3, 1024, %s131_s28, [#allocation12], %s1074_s9, %s1074_s9, %s1075_s10  }
  0x21   : > { %p29_p7 = scmp.eq.s32.totalorder %s28_s7, 0  ;;  %p38_p9 = scmp.ne.s32.totalorder %s1054_s23, %s1050_s22 }
  0x22   : > { %p39_p10 = scmp.eq.s32.totalorder %s1058_s24, 0  ;;  %p784_p11 = scmp.lt.s32.totalorder %s1058_s24, 3 }
  0x23   : > { %s1183_s13 = scalar_select %p29_p7, %s1054_s23, %s31_s6  }
  0x24   : > { %p40_p12 = por %p39_p10, %p38_p9  ;;  %s147_s14 = sand.u32 1, %s1054_s23  }
  0x25   : > { %s648_s15 = sshll.u32 %s1058_s24, 4  ;;  %s150_s16 = scalar_lea.vmem [#allocation8], %s147_s14 }
  0x26   : > { %s157_s17 = sshll.u32 %s150_s16, 4  ;;  %s1348_s1 = sld [smem:[#allocation25_spill]]  ;;  %s158_s17 = int_to_ptr.vmem [resolvable:$true] %s157_s17 }
  0x27   : > { %p1192_p8 = pnand %p784_p11, %p40_p12  ;;  %s148_s27 = scalar_lea.sflag [#allocation9], %s147_s14 }
  0x29   : > { %p906_p0 = pneg %p1192_p8 }
  0x2c   : > { %s1190_s20 = scalar_lea.hbm %s1348_s1, %s648_s15  ;;  %s909_s6 = scalar_lea.hbm %s1348_s1, 48 }
  0x2d   : > { %s904_s28 = scalar_lea.hbm %s1190_s20, 16  ;;  %p910_p7 = scmp.lt.s32.totalorder %s1190_s20, %s1348_s1 }
  0x2e   : > { %p905_p13 = scmp.ne.s32.totalorder %s1190_s20, %s904_s28  ;;  %p911_p9 = scmp.lt.s32.totalorder %s909_s6, %s904_s28 }
  0x30   : > { %p907_p2 = pnand %p906_p0, %p905_p13  ;;  %p912_p10 = por %p911_p9, %p910_p7 }
  0x32   : > { %p908_p3 = pneg %p907_p2 }
  0x34   : > { %p913_p11 = pnand %p912_p10, %p908_p3 }
  0x36   : > { %916 = shalt.err (!%p913_p11)
}
  0x37   : > { %s917_s9 = scalar_lea.vmem %s158_s17, 16  ;;  %s1076_s10 = smov [#allocation8]  }
  0x38   : > { %p918_p12 = scmp.ne.s32.totalorder %s158_s17, %s917_s9  ;;  %s922_s11 = sshll.u32 %s1076_s10, 4  ;;  %s923_s11 = int_to_ptr.vmem [resolvable:$false] %s922_s11 }
  0x39   : > { %s924_s12 = scalar_lea.vmem %s923_s11, 32  ;;  %p925_p13 = scmp.lt.s32.totalorder %s158_s17, %s923_s11 }
  0x3a   : > { %p920_p4 = pnand %p918_p12, %p906_p0  ;;  %p926_p2 = scmp.lt.s32.totalorder %s924_s12, %s917_s9 }
  0x3c   : > { %p921_p1 = pneg %p920_p4  ;;  %p927_p5 = por %p926_p2, %p925_p13 }
  0x3e   : > { %p928_p6 = pnand %p927_p5, %p921_p1 }
  0x40   : > { %931 = shalt.err (!%p928_p6)
}
  0x41   : > { %782 = dma.hbm_to_vmem [thread:$0]  (!%p1192_p8), %s1190_s20, 16, %s158_s17, %s148_s27  }
  0x42   : > { %p1350_p3 = scmp.ne.s32.totalorder %s1346_s26, 0 }
  0x43   : > { %s168_s14 = sand.u32 (!%p1350_p3), 1, %s1050_s22   ;;  %p1351_p4 = scmp.ne.s32.totalorder (!%p1350_p3), %s1345_s25, 0 }
  0x44   : > { %166 = sbr.rel (%p1350_p3) target bundleno = 773 (0x305), region = 32  ;;  %s169_s15 = scalar_lea.sflag (!%p1350_p3), [#allocation9], %s168_s14 }
  0x45   : > { %s1213_s16 = scalar_lea.vmem (!%p1350_p3), [#allocation8], %s168_s14 }
  0x49   : > { %1031 = dma.done.wait (%p1351_p4), %s169_s15, 16  }
  0x4a   : > { %1033 = vsyncadd (%p1351_p4), %s169_s15, 4294967280  ;;  %p1352_p1 = scmp.eq.s32.totalorder %s1140_s0, 0 }
  0x4c   : > { %1035 = dma.done.wait (%p1352_p1), [#allocation12], 1024   ;;  %p1353_p5 = pmov %p1352_p1 }
  0x4d   : > { %p193_p6 = scmp.lt.s32.totalorder %s1140_s0, 0  ;;  %s194_s26 = ssub.s32 0, %s1140_s0 }
  0x4e   : > { %1037 = vsyncadd (%p1353_p5), [#allocation12], 4294966272  ;;  %s651_s17 = smin.u32 %s1140_s0, %s194_s26  ;;  %s1227_s18 = sadd.s32 1, %s1140_s0 }
  0x4f   : > { %s196_s25 = sand.u32 1, %s651_s17   ;;  %p200_p8 = scmp.lt.s32.totalorder %s1227_s18, 0 }
  0x50   : > { %s197_s19 = ssub.s32 0, %s196_s25  ;;  %s201_s20 = ssub.s32 0, %s1227_s18 }
  0x51   : > { %s1360_s19 = smov (!%p193_p6, %s197_s19), %s196_s25  ;;  %s652_s21 = smin.u32 %s201_s20, %s1227_s18 }
  0x52   : > { %s203_s27 = sand.u32 1, %s652_s21   ;;  %p1354_p0 = scmp.ne.s32.totalorder %s1140_s0, 0 }
  0x53   : > { %s204_s28 = ssub.s32 0, %s203_s27  ;;  %s1238_s24 = smov (!%p1354_p0), 0  }
  0x54   : > { %s1362_s28 = smov (!%p200_p8, %s204_s28), %s203_s27  ;;  %209 = sbr.rel (%p1354_p0) target bundleno = 127 (0x7f), region = 44 }
  0x59   : > { %vm212_vm0 = vcmask 7168   ;;  %v1077_v0 = vmov 0.0  }
  0x5a   : > { %210 = vst [vmem:[#allocation4] sm:$0xff] %v1077_v0  ;;  %211 = vst [vmem:[#allocation4 + $0x8] sm:$0xff] %v1077_v0 }
  0x5b   : > { %213 = vst.msk [vmem:[#allocation5] sm:$0xff] %vm212_vm0, %v1077_v0  ;;  %214 = vst.msk [vmem:[#allocation5 + $0x8] sm:$0xff] %vm212_vm0, %v1077_v0 }
  0x5c LB: >> { %s221_s29 = sld [smem:[#allocation7 + %s1062_s24]]  ;;  %s224_s6 = scalar_lea.vmem [#allocation2], %s1062_s24  ;;  %s1062_s24 = sphi %s1238_s24, %s220_s24  }
  0x5d   : >> { %s232_s7 = sshll.u32 %s224_s6, 4  ;;  %s934_s26 = scalar_lea.hbm %s1337_s2, 8064  ;;  %s233_s7 = int_to_ptr.vmem [resolvable:$true] %s232_s7 }
  0x62   : >> { %s654_s8 = sshll.u32 %s221_s29, 4 }
  0x63   : >> { %s223_s11 = scalar_lea.hbm %s1337_s2, %s654_s8 }
  0x64   : >> { %s932_s12 = scalar_lea.hbm %s223_s11, 16  ;;  %p935_p9 = scmp.lt.s32.totalorder %s223_s11, %s1337_s2 }
  0x65   : >> { %p933_p7 = scmp.ne.s32.totalorder %s223_s11, %s932_s12  ;;  %p936_p10 = scmp.lt.s32.totalorder %s934_s26, %s932_s12 }
  0x67   : >> { %p937_p11 = por %p936_p10, %p935_p9 }
  0x69   : >> { %p938_p12 = pnand %p937_p11, %p933_p7 }
  0x6b   : >> { %941 = shalt.err (!%p938_p12)  }
  0x6c   : >> { %s942_s20 = scalar_lea.vmem %s233_s7, 16  ;;  %s1078_s21 = smov [#allocation2]  }
  0x6d   : >> { %p943_p13 = scmp.ne.s32.totalorder %s233_s7, %s942_s20  ;;  %s944_s27 = sshll.u32 %s1078_s21, 4  ;;  %s945_s27 = int_to_ptr.vmem [resolvable:$false] %s944_s27 }
  0x6e   : >> { %s946_s29 = scalar_lea.vmem %s945_s27, 4096  ;;  %p947_p2 = scmp.lt.s32.totalorder %s233_s7, %s945_s27 }
  0x6f   : >> { %p948_p3 = scmp.lt.s32.totalorder %s946_s29, %s942_s20 }
  0x71   : >> { %p949_p4 = por %p948_p3, %p947_p2 }
  0x73   : >> { %p950_p1 = pnand %p949_p4, %p943_p13 }
  0x75   : >> { %953 = shalt.err (!%p950_p1)  }
  0x76   : >> { %235 = dma.hbm_to_vmem [thread:$0]  %s223_s11, 16, %s233_s7, [#allocation3] }
  0x77   : >> { %s220_s24 = sadd.s32 1, %s1062_s24  }
  0x78   : >> { %p217_p5 = scmp.ge.s32.totalorder %s220_s24, 128  }
  0x7a   : > { %219 = sbr.rel (!%p217_p5) target bundleno = 92 (0x5c), region = 122 }
  0x7f PF: > { %p655_p6 = scmp.ge.s32.totalorder %s1227_s18, 3 }
  0x80   : > { %s681_s6 = sshll.u32 (!%p655_p6), %s1140_s0, 7  ;;  %s1261_s9 = smov (!%p655_p6), 0  }
  0x81   : > { %239 = sbr.rel (%p655_p6) target bundleno = 170 (0xaa), region = 59  ;;  %s1259_s8 = sadd.s32 (!%p655_p6), 128, %s681_s6 }
  0x86 LB: >> { %s658_s24 = sshll.u32 %s1362_s28, 7  ;;  %s247_s7 = sadd.s32 %s1066_s9, %s1259_s8  ;;  %s1066_s9 = sphi %s1261_s9, %s246_s9  }
  0x87   : >> { %s252_s18 = sadd.s32 %s1066_s9, %s658_s24  ;;  %s248_s10 = sld [smem:[#allocation7 + %s247_s7]] }
  0x88   : >> { %s253_s11 = scalar_lea.vmem [#allocation2], %s252_s18  ;;  %s254_s25 = scalar_lea.sflag [#allocation3], %s1362_s28 }
  0x89   : >> { %s262_s12 = sshll.u32 %s253_s11, 4  ;;  %s956_s29 = scalar_lea.hbm %s1337_s2, 8064  ;;  %s263_s12 = int_to_ptr.vmem [resolvable:$true] %s262_s12 }
  0x8d   : >> { %s657_s14 = sshll.u32 %s248_s10, 4 }
  0x8e   : >> { %s250_s17 = scalar_lea.hbm %s1337_s2, %s657_s14 }
  0x8f   : >> { %s954_s20 = scalar_lea.hbm %s250_s17, 16  ;;  %p957_p0 = scmp.lt.s32.totalorder %s250_s17, %s1337_s2 }
  0x90   : >> { %p955_p8 = scmp.ne.s32.totalorder %s250_s17, %s954_s20  ;;  %p958_p7 = scmp.lt.s32.totalorder %s956_s29, %s954_s20 }
  0x92   : >> { %p959_p9 = por %p958_p7, %p957_p0 }
  0x94   : >> { %p960_p10 = pnand %p959_p9, %p955_p8 }
  0x96   : >> { %963 = shalt.err (!%p960_p10)  }
  0x97   : >> { %s964_s24 = scalar_lea.vmem %s263_s12, 16  ;;  %s1079_s7 = smov [#allocation2]  }
  0x98   : >> { %p965_p11 = scmp.ne.s32.totalorder %s263_s12, %s964_s24  ;;  %s966_s18 = sshll.u32 %s1079_s7, 4  ;;  %s967_s18 = int_to_ptr.vmem [resolvable:$false] %s966_s18 }
  0x99   : >> { %s968_s10 = scalar_lea.vmem %s967_s18, 4096  ;;  %p969_p12 = scmp.lt.s32.totalorder %s263_s12, %s967_s18 }
  0x9a   : >> { %p970_p13 = scmp.lt.s32.totalorder %s968_s10, %s964_s24 }
  0x9c   : >> { %p971_p2 = por %p970_p13, %p969_p12 }
  0x9e   : >> { %p972_p3 = pnand %p971_p2, %p965_p11 }
  0xa0   : >> { %975 = shalt.err (!%p972_p3)  }
  0xa1   : >> { %265 = dma.hbm_to_vmem [thread:$0]  %s250_s17, 16, %s263_s12, %s254_s25 }
  0xa2   : >> { %s246_s9 = sadd.s32 1, %s1066_s9  }
  0xa3   : >> { %p243_p4 = scmp.ge.s32.totalorder %s246_s9, 128  }
  0xa5   : > { %245 = sbr.rel (!%p243_p4) target bundleno = 134 (0x86), region = 133 }
  0xaa PF: > { %s1068_s1 = smov 0  }
  0xab LB: >> { %s272_s11 = scalar_lea.sflag [#allocation3], %s1360_s19  ;;  %s1070_s1 = sphi %s1068_s1, %s271_s1  }
  0xac   : >> { %1038 = dma.done.wait %s272_s11, 16 }
  0xad   : >> { %1039 = vsyncadd %s272_s11, 4294967280  ;;  %s271_s1 = sadd.s32 1, %s1070_s1  }
  0xae   : >> { %p268_p1 = scmp.ge.s32.totalorder %s271_s1, 128  }
  0xaf   : > { %s662_s12 = sshll.u32 (%p268_p1), %s1360_s19, 7  ;;  %v275_v1 = vlaneseq (%p268_p1)  ;;  %v659_v2 = vld [vmem:[%s1213_s16] ss:$0 sm:$0xff] (%p268_p1)  ;;  %v1080_v8 = vmov (%p268_p1), 1.0   ;;  %v1081_v9 = vmov (%p268_p1), 0.0   ;;  %v388_v25 = vld [vmem:[#allocation5] sm:$0xff] (%p268_p1) }
  0xb0   : > { %270 = sbr.rel (!%p268_p1) target bundleno = 171 (0xab), region = 144  ;;  %s1286_s9 = scalar_lea.vmem (%p268_p1), [#allocation2], %s662_s12  ;;  %vm396_vm3 = vcmask (%p268_p1), 7168   ;;  %v389_v28 = vld [vmem:[#allocation5 + $0x8] sm:$0xff] (%p268_p1)  ;;  %v290_v31 = vld [vmem:[#allocation4 + $0x8] sm:$0xff] (%p268_p1)  ;;  %v289_v33 = vld [vmem:[#allocation4] sm:$0xff] (%p268_p1) }
  0xb1   : > { %v308_v3 = vld [vmem:[%s1286_s9 + $0x78] sm:$0xff] (%p268_p1)  ;;  %v307_v4 = vld [vmem:[%s1286_s9 + $0x70] sm:$0xff] (%p268_p1)  ;;  %v276_v5 = vshrl.u32 (%p268_p1), %v275_v1, 7  ;;  %v306_v6 = vld [vmem:[%s1286_s9 + $0x68] sm:$0xff] (%p268_p1)  ;;  %p665_p5 = scmp.ne.s32.totalorder (%p268_p1), %s1140_s0, 2 }
  0xb2   : > { %710 = vmatprep.subr.mxu0 (%p268_p1), %v308_v3  ;;  %v305_v11 = vld [vmem:[%s1286_s9 + $0x60] sm:$0xff] (%p268_p1)  ;;  %v304_v13 = vld [vmem:[%s1286_s9 + $0x58] sm:$0xff] (%p268_p1)  ;;  %v303_v14 = vld [vmem:[%s1286_s9 + $0x50] sm:$0xff] (%p268_p1) }
  0xb3   : > { %711 = vmatpush3.msra.mxu0 (%p268_p1), %v308_v3  ;;  %v277_v7 = vadd.s32 (%p268_p1), 8, %v276_v5  ;;  %vm283_vm1 = vcmp.eq.s32.totalorder (%p268_p1), %v659_v2, %v276_v5  ;;  %v302_v15 = vld [vmem:[%s1286_s9 + $0x48] sm:$0xff] (%p268_p1)  ;;  %v301_v16 = vld [vmem:[%s1286_s9 + $0x40] sm:$0xff] (%p268_p1)  ;;  %v300_v17 = vld [vmem:[%s1286_s9 + $0x38] sm:$0xff] (%p268_p1) }
  0xb4   : > { %712 = vmatprep.subr.mxu0 (%p268_p1), %v307_v4  ;;  %742 = vmatprep.mubr.msk.f32.mxu0 (%p268_p1), %vm283_vm1, %v1080_v8  ;;  %v660_v10 = vsel (%p268_p1), %vm283_vm1, 1.0, %v1081_v9  ;;  %v299_v18 = vld [vmem:[%s1286_s9 + $0x30] sm:$0xff] (%p268_p1)  ;;  %v298_v19 = vld [vmem:[%s1286_s9 + $0x28] sm:$0xff] (%p268_p1)  ;;  %v297_v20 = vld [vmem:[%s1286_s9 + $0x20] sm:$0xff] (%p268_p1) }
  0xb5   : > { %713 = vmatpush3.msra.mxu0 %v307_v4  ;;  %vm284_vm2 = vcmp.eq.s32.totalorder %v659_v2, %v277_v7  ;;  %390 = vadd.xlane.f32.xlu0 %v660_v10  ;;  %v296_v21 = vld [vmem:[%s1286_s9 + $0x18] sm:$0xff]  ;;  %v295_v22 = vld [vmem:[%s1286_s9 + $0x10] sm:$0xff]  ;;  %v294_v23 = vld [vmem:[%s1286_s9 + $0x8] sm:$0xff] }
  0xb6   : > { %714 = vmatprep.subr.mxu0 %v306_v6  ;;  %v661_v12 = vsel %vm284_vm2, 1.0, %v1081_v9  ;;  %v293_v24 = vld [vmem:[%s1286_s9] sm:$0xff] }
  0xb7   : > { %715 = vmatpush3.msra.mxu0 %v306_v6 }
  0xb8   : > { %716 = vmatprep.subr.mxu0 %v305_v11 }
  0xb9   : > { %717 = vmatpush3.msra.mxu0 %v305_v11  ;;  %392 = vadd.xlane.f32.xlu0 %v661_v12 }
  0xba   : > { %718 = vmatprep.subr.mxu0 %v304_v13 }
  0xbb   : > { %719 = vmatpush3.msra.mxu0 %v304_v13 }
  0xbc   : > { %720 = vmatprep.subr.mxu0 %v303_v14 }
  0xbd   : > { %721 = vmatpush3.msra.mxu0 %v303_v14 }
  0xbe   : > { %722 = vmatprep.subr.mxu0 %v302_v15 }
  0xbf   : > { %723 = vmatpush3.msra.mxu0 %v302_v15 }
  0xc0   : > { %724 = vmatprep.subr.mxu0 %v301_v16 }
  0xc1   : > { %725 = vmatpush3.msra.mxu0 %v301_v16 }
  0xc2   : > { %726 = vmatprep.subr.mxu0 %v300_v17 }
  0xc3   : > { %727 = vmatpush3.msra.mxu0 %v300_v17 }
  0xc4   : > { %728 = vmatprep.subr.mxu0 %v299_v18 }
  0xc5   : > { %729 = vmatpush3.msra.mxu0 %v299_v18 }
  0xc6   : > { %730 = vmatprep.subr.mxu0 %v298_v19 }
  0xc7   : > { %731 = vmatpush3.msra.mxu0 %v298_v19 }
  0xc8   : > { %732 = vmatprep.subr.mxu0 %v297_v20 }
  0xc9   : > { %733 = vmatpush3.msra.mxu0 %v297_v20 }
  0xca   : > { %734 = vmatprep.subr.mxu0 %v296_v21 }
  0xcb   : > { %735 = vmatpush3.msra.mxu0 %v296_v21 }
  0xcc   : > { %736 = vmatprep.subr.mxu0 %v295_v22 }
  0xcd   : > { %737 = vmatpush3.msra.mxu0 %v295_v22 }
  0xce   : > { %738 = vmatprep.subr.mxu0 %v294_v23 }
  0xcf   : > { %739 = vmatpush3.msra.mxu0 %v294_v23 }
  0xd0   : > { %740 = vmatprep.subr.mxu0 %v293_v24 }
  0xd1   : > { %741 = vmatpush3.msra.mxu0 %v293_v24 }
  0xd2   : > { %743 = vmatmul.mubr.msk.f32.vlgmr.msra.gmra.mxu0 %vm284_vm2, %v1080_v8 }
 0x13e   : > { %v391_v26 = vpop.xlane.xlu0 %390 }
 0x13f   : > { %v394_v27 = vadd.f32 %v391_v26, %v388_v25 }
 0x141   : > { %397 = vst.msk [vmem:[#allocation5] sm:$0xff] %vm396_vm3, %v394_v27 }
 0x142   : > { %v393_v29 = vpop.xlane.xlu0 %392 }
 0x143   : > { %v395_v30 = vadd.f32 %v393_v29, %v389_v28 }
 0x145   : > { %398 = vst.msk [vmem:[#allocation5 + $0x8] sm:$0xff] %vm396_vm3, %v395_v30 }
 0x192   : > { %v744_v32 = vpop.f32.mrf.mxu0 }
 0x193   : > { %v385_v34 = vadd.f32 %v744_v32, %v290_v31  ;;  %402 = sbr.rel (%p665_p5) target bundleno = 757 (0x2f5), region = 81 }
 0x194   : > { %v375_v35 = vpop.f32.mrf.mxu0 }
 0x195   : > { %387 = vst [vmem:[#allocation4 + $0x8] sm:$0xff] %v385_v34  ;;  %v384_v36 = vadd.f32 %v375_v35, %v289_v33 }
 0x197   : > { %386 = vst [vmem:[#allocation4] sm:$0xff] %v384_v36 }
 0x198   : > { %v403_v37 = vld [vmem:[#allocation5] sm:$0xff]  ;;  %v404_v38 = vld [vmem:[#allocation5 + $0x8] sm:$0xff]  ;;  %v1082_v39 = vmov 0   ;;  %v1083_v42 = vmov 0.0   ;;  %v861_v46 = vld [vmem:[#allocation11 + $0x20] sm:$0xff]   ;;  %vm1084_vm4 = vmmov 0  }
 0x199   : > { %857 = vset.pattern.permute.xlu0 %v1082_v39  ;;  %v405_v40 = vmax.f32 %v403_v37, 1.0  ;;  %v406_v41 = vmax.f32 %v404_v38, 1.0  ;;  %745 = vmatprep.subr.bf16.mxu0 %v1083_v42  ;;  %v858_v43 = vld [vmem:[#allocation11 + $0x38] sm:$0xff]   ;;  %v859_v44 = vld [vmem:[#allocation11 + $0x30] sm:$0xff]   ;;  %v860_v45 = vld [vmem:[#allocation11 + $0x28] sm:$0xff]  }
 0x19a   : > { %746 = vmatpush3.bf16.msra.mxu0 %v858_v43  ;;  %v862_v47 = vld [vmem:[#allocation11 + $0x18] sm:$0xff]   ;;  %v863_v50 = vld [vmem:[#allocation11 + $0x10] sm:$0xff]   ;;  %761 = vmatprep.mubr.msk.bf16.mxu0 %vm1084_vm4, %v1083_v42  ;;  %v864_v51 = vld [vmem:[#allocation11 + $0x8] sm:$0xff]  }
 0x19b   : > { %866 = vrcp.f32 %v405_v40  ;;  %747 = vmatprep.subr.bf16.mxu0 %v1083_v42  ;;  %v865_v52 = vld [vmem:[#allocation11] sm:$0xff]   ;;  %v666_v60 = vld [vmem:[%s1339_s4] ss:$0 sm:$0xff] }
 0x19c   : > { %868 = vrcp.f32 %v406_v41  ;;  %v410_v55 = vld [vmem:[#allocation4 + $0x8] sm:$0xff] }
 0x19e   : > { %748 = vmatpush3.bf16.msra.mxu0 %v859_v44  ;;  %v409_v54 = vld [vmem:[#allocation4] sm:$0xff] }
 0x19f   : > { %749 = vmatprep.subr.bf16.mxu0 %v1083_v42 }
 0x1a2   : > { %750 = vmatpush3.bf16.msra.mxu0 %v860_v45 }
 0x1a3   : > { %751 = vmatprep.subr.bf16.mxu0 %v1083_v42 }
 0x1a6   : > { %752 = vmatpush3.bf16.msra.mxu0 %v861_v46 }
 0x1a7   : > { %753 = vmatprep.subr.bf16.mxu0 %v1083_v42 }
 0x1a8   : > { %v867_v48 = vpop.eup %866 }
 0x1a9   : > { %413 = vperm.xlu0 %857, %v867_v48   ;;  %v869_v49 = vpop.eup %868 }
 0x1aa   : > { %754 = vmatpush3.bf16.msra.mxu0 %v862_v47 }
 0x1ab   : > { %755 = vmatprep.subr.bf16.mxu0 %v1083_v42 }
 0x1ad   : > { %418 = vperm.xlu0 %857, %v869_v49  }
 0x1ae   : > { %756 = vmatpush3.bf16.msra.mxu0 %v863_v50 }
 0x1af   : > { %757 = vmatprep.subr.bf16.mxu0 %v1083_v42 }
 0x1b2   : > { %758 = vmatpush3.bf16.msra.mxu0 %v864_v51 }
 0x1b3   : > { %759 = vmatprep.subr.bf16.mxu0 %v1083_v42 }
 0x1b6   : > { %760 = vmatpush3.bf16.msra.mxu0 %v865_v52 }
 0x224   : > { %v414_v53 = vpop.permute.xlu0 %413 }
 0x225   : > { %v421_v57 = vmul.f32 %v414_v53, %v409_v54 }
 0x228   : > { %v419_v56 = vpop.permute.xlu0 %418 }
 0x229   : > { %v422_v58 = vmul.f32 %v419_v56, %v410_v55 }
 0x22b   : > { %v423_v59 = vpack.c.bf16 %v422_v58, %v421_v57 }
 0x22d   : > { %762 = vmatmul.mubr.bf16.vlgmr.msra.gmra.mxu0 %v423_v59 }
 0x2ed   : > { %v529_v61 = vpop.f32.mrf.mxu0 }
 0x2ee   : > { %v530_v62 = vadd.f32 %v666_v60, %v529_v61 }
 0x2ef   : > { %v763_v63 = vpop.f32.mrf.mxu0 }
 0x2f0   : > { %536 = vst [vmem:[#allocation13] sm:$0xff] %v530_v62 }
 0x2f1   : > { %v532_v0 = vpop.f32.mrf.mxu0 }
 0x2f2   : > { %v533_v1 = vadd.f32 %v666_v60, %v532_v0 }
 0x2f3   : > { %v764_v2 = vpop.f32.mrf.mxu0 }
 0x2f4   : > { %537 = vst [vmem:[#allocation13 + $0x8] sm:$0xff] %v533_v1 }
 0x2f5 PF: > { %p786_p6 = scmp.eq.s32.totalorder %s1140_s0, 2  ;;  %s1085_s28 = smov [#allocation13]  }
 0x2f6   : > { %s544_s8 = sshll.u32 %s1085_s28, 4  ;;  %s545_s8 = int_to_ptr.vmem [resolvable:$true] %s544_s8 }
 0x2f7   : > { %s976_s14 = scalar_lea.vmem %s545_s8, 256  ;;  %p983_p9 = scmp.lt.s32.totalorder %s545_s8, %s545_s8 }
 0x2f8   : > { %p977_p8 = scmp.ne.s32.totalorder %s545_s8, %s976_s14  ;;  %p984_p10 = scmp.lt.s32.totalorder %s976_s14, %s976_s14 }
 0x2fa   : > { %p978_p0 = pnand %p977_p8, %p786_p6  ;;  %p985_p11 = por %p984_p10, %p983_p9 }
 0x2fc   : > { %p979_p7 = pneg %p978_p0 }
 0x2fe   : > { %p986_p12 = pnand %p985_p11, %p979_p7 }
 0x300   : > { %989 = shalt.err (!%p986_p12)
}
 0x301   : > { %s1086_s15 = smov 128   ;;  %s1087_s26 = smov 8  }
 0x302   : > { %772 = dma.vmem_to_hbm [thread:$0]  (%p786_p6), %s545_s8, 256, %s1340_s5, [#allocation10], %s1086_s15, %s1086_s15, %s1087_s26  }
 0x303   : > { %1041 = dma.done.wait (%p786_p6), [#allocation10], 256  }
 0x304   : > { %1043 = vsyncadd (%p786_p6), [#allocation10], 4294967040 }
 0x305 PF: > { %p21_p13 = scmp.ge.s32.totalorder %s1166_s30, 5   ;;  %s1355_s21 = smov %s1050_s22 }
 0x306   : > { %s1356_s22 = smov %s1054_s23  ;;  %s1357_s23 = smov %s1183_s13 }
 0x307   : > { %s1358_s24 = smov %s1166_s30  ;;  %23 = sbr.rel (!%p21_p13) target bundleno = 11 (0xb), region = 155 }
 0x30c   :  { %560 = vsyncpa [#allocation9], 1 }
 0x30d   :  { %562 = vsyncpa [#allocation9 + $0x1], 1 }
 0x30e   :  { %563 = vsyncpa [#allocation12], 1 }
 0x30f   :  { %564 = vsyncpa [#allocation10], 1 }
 0x310   :  { %566 = vsyncpa [#allocation10 + $0x1], 1 }
 0x311   :  { %567 = vsyncmov [#allocation3] }
 0x314   :  { %s568_s0 = vpop.sfrf %567 }
 0x315   :  { %p679_p2 = scmp.ne.s32.totalorder %s568_s0, 0 }
 0x317   :  { %572 = shalt.err (%p679_p2)  }
 0x318   :  { %574 = vsyncmov [#allocation3 + $0x1] }
 0x31b   :  { %s575_s20 = vpop.sfrf %574 }
 0x31c   :  { %p680_p3 = scmp.ne.s32.totalorder %s575_s20, 0 }
 0x31e   :  { %579 = shalt.err (%p680_p3)  }

</bundles_post_ra>
